<compile_context>
chip_gen: v7x
topology: tpu7x:2x2x1
jax: 0.10.0
libtpu: 0.0.40
codegen_flags: <defaults>
</compile_context>

<pallas_src>
import functools

import jax
import jax.numpy as jnp
from jax.experimental import pallas as pl
from jax.experimental.pallas import tpu as pltpu


def _round_up(x, m):
    return ((x + m - 1) // m) * m


def _tpu_generation_info():
    """(vmem_capacity_bytes, tensorcores_per_device) with safe fallbacks."""
    vmem_bytes = 64 * 1024 * 1024  # conservative default (v7x per-TC VMEM)
    num_tc = 1
    try:
        vmem_bytes = int(pltpu.get_tpu_info().vmem_capacity_bytes)
    except Exception:
        pass
    try:
        kind = jax.devices()[0].device_kind.lower()
        if "v7" in kind or "v4" in kind:
            num_tc = 2
    except Exception:
        pass
    return vmem_bytes, num_tc


def _dlr_kernel(x_ref, u_ref, w2_ref, b_ref, o_ref, *, apply_relu):
    # (tm, in) @ (in, r) -> (tm, r), f32 accumulation on the MXU.
    h = jnp.dot(x_ref[...], u_ref[...], preferred_element_type=jnp.float32)
    # Keep both operands of the second matmul in the compute dtype (native
    # bf16 MXU rate when compute dtype is bf16; no-op for f32).
    h = h.astype(w2_ref.dtype)
    # (tm, r) @ (r, out) -> (tm, out).  W2 = S @ V^T precomputed in wrapper.
    y = jnp.dot(h, w2_ref[...], preferred_element_type=jnp.float32)
    y = y + b_ref[...]                      # bias (1, out) broadcasts over rows
    if apply_relu:
        y = jnp.maximum(y, 0.0)
    o_ref[...] = y.astype(o_ref.dtype)


def dynamic_low_rank_forward(x, U, S, V, bias, *, activation=None, tm=None,
                             compute_in_bf16=False):
    """y = act(((x @ U) @ S) @ V^T + bias).  activation: None or 'relu'."""
    if activation not in (None, "relu"):
        raise ValueError(f"Unsupported activation: {activation!r}")

    batch, input_size = x.shape
    rank = U.shape[1]
    output_size = V.shape[0]
    assert U.shape == (input_size, rank)
    assert S.shape == (rank, rank)
    assert V.shape == (output_size, rank)
    assert bias.shape == (output_size,)

    compute_dtype = jnp.bfloat16 if compute_in_bf16 else x.dtype
    itemsize = jnp.dtype(compute_dtype).itemsize
    # bf16 packs 2 rows per sublane -> 16-row granule; f32 -> 8.
    sub = 16 if itemsize == 2 else 8

    # --- fold S and the V transpose into one (rank, output_size) weight ----
    # Done once in the wrapper; removes one MXU pass and the per-tile V.T.
    W2 = jnp.dot(S.astype(jnp.float32), V.astype(jnp.float32).T).astype(compute_dtype)
    bias2 = bias.astype(compute_dtype).reshape(1, output_size)
    x_c = x.astype(compute_dtype)
    U_c = U.astype(compute_dtype)

    vmem_cap, num_tc = _tpu_generation_info()

    # Resident (grid-invariant) operand footprint; Pallas may double-buffer.
    weight_bytes = (input_size * rank + rank * output_size + output_size) * itemsize

    # Generation-aware scoped-VMEM target: large on 128 MiB chips, 16 MiB
    # headroom under the 64 MiB v7x cap, never below 32 MiB (v5e default is 16).
    vmem_target = max(32 * 1024 * 1024, min(100 * 1024 * 1024, vmem_cap - 16 * 1024 * 1024))

    # --- batch tile: biggest double-buffered x+y tile pair that fits --------
    rows_needed = _round_up(batch, sub)
    bytes_per_row = 2 * (input_size + output_size) * itemsize   # x + y, double-buffered
    if tm is None:
        tile_budget = vmem_target - 2 * weight_bytes - (4 << 20)
        tile_budget = max(4 * 1024 * 1024, min(48 * 1024 * 1024, tile_budget))
        tm = max(sub, min(1024, tile_budget // bytes_per_row))
        # Keep MXU feeding / stores in full-tile granules when tm is large.
        if tm >= 256:
            tm = (tm // 256) * 256
        elif tm >= 128:
            tm = (tm // 128) * 128
        else:
            tm = max(sub, (tm // sub) * sub)
    tm = min(int(tm), rows_needed)

    # Split across TensorCores only on dual-TC chips, with a balanced step count.
    steps = pl.cdiv(batch, tm)
    if num_tc > 1 and rows_needed >= num_tc * sub and steps % num_tc != 0:
        steps = _round_up(steps, num_tc)
        tm = max(sub, _round_up(pl.cdiv(batch, steps), sub))
    grid = (pl.cdiv(batch, tm),)

    # TODO(synk): for input_size large enough that resident U + a full-width x
    # tile no longer fit VMEM (relevant first on v7x's 64 MiB), add a K
    # (input_size) reduction grid axis marked "arbitrary" with a (tm, rank)
    # f32 accumulator instead of shrinking tm.

    tile_bytes = tm * bytes_per_row
    vmem_limit = int(min(vmem_target,
                         max(32 * 1024 * 1024, 2 * weight_bytes + tile_bytes + (4 << 20))))

    cost = pl.CostEstimate(
        flops=2 * batch * rank * (input_size + output_size),
        transcendentals=0,
        bytes_accessed=batch * (input_size + output_size) * itemsize + weight_bytes,
    )

    kernel = functools.partial(_dlr_kernel, apply_relu=(activation == "relu"))

    # No batch padding and no output lane padding: out block last dim equals
    # the full output_size (allowed by the (8,128) rule), so there is no extra
    # pad/slice HBM pass; the ragged trailing batch block is masked by Pallas.
    y = pl.pallas_call(
        kernel,
        out_shape=jax.ShapeDtypeStruct((batch, output_size), compute_dtype),
        grid_spec=pltpu.PrefetchScalarGridSpec(
            num_scalar_prefetch=0,
            grid=grid,
            in_specs=[
                pl.BlockSpec((tm, input_size), lambda i: (i, 0)),       # x tile (streamed)
                # Grid-invariant operands (constant index_map) stay resident.
                pl.BlockSpec((input_size, rank), lambda i: (0, 0)),     # U (full)
                pl.BlockSpec((rank, output_size), lambda i: (0, 0)),    # W2 = S @ V^T
                pl.BlockSpec((1, output_size), lambda i: (0, 0)),       # bias
            ],
            out_specs=pl.BlockSpec((tm, output_size), lambda i: (i, 0)),
        ),
        compiler_params=pltpu.CompilerParams(
            dimension_semantics=("parallel",),
            vmem_limit_bytes=vmem_limit,
        ),
        cost_estimate=cost,
    )(x_c, U_c, W2, bias2)

    return y


def init_params(key, input_size, output_size, rank, dtype=jnp.float32):
    """Deterministic init mirroring the PyTorch __init__ (QR of a random matrix)."""
    if rank > min(input_size, output_size):
        raise ValueError(
            "The rank cannot be larger than the minimum of input_size and output_size."
        )
    k_a, k_s, k_b = jax.random.split(key, 3)
    A = jax.random.normal(k_a, (input_size + output_size, rank), dtype=jnp.float32)
    Q, _ = jnp.linalg.qr(A, mode="reduced")
    U = Q[:input_size, :].astype(dtype)
    V = Q[input_size:, :].astype(dtype)
    S = jax.random.normal(k_s, (rank, rank), dtype=dtype)
    bias = jax.random.normal(k_b, (output_size,), dtype=dtype)
    return U, S, V, bias


def reference_forward(x, U, S, V, bias, activation=None):
    y = x @ U
    y = y @ S
    y = y @ V.T
    y = y + bias
    if activation == "relu":
        y = jnp.maximum(y, 0.0)
    return y


if __name__ == "__main__":
    # Small shapes consistent with the module: a dense low-rank linear layer.
    batch, input_size, output_size, rank = 16, 32, 24, 8
    activation = "relu"  # corresponds to passing nn.ReLU() to the module

    key = jax.random.PRNGKey(0)
    k_params, k_x = jax.random.split(key)
    U, S, V, bias = init_params(k_params, input_size, output_size, rank)
    x = jax.random.normal(k_x, (batch, input_size), dtype=jnp.float32)

    out = dynamic_low_rank_forward(x, U, S, V, bias, activation=activation)
    out = jax.block_until_ready(out)
    ref = reference_forward(x, U, S, V, bias, activation=activation)
    assert out.shape == (batch, output_size)
    assert jnp.allclose(out, ref, atol=1e-5, rtol=1e-5), "mismatch vs JAX reference"

    # Ragged batch (not a multiple of the tile / sublane granule) exercises the
    # masked edge-block path that replaced the wrapper-side pad/slice.
    x_odd = jax.random.normal(jax.random.PRNGKey(1), (13, input_size), dtype=jnp.float32)
    out_odd = jax.block_until_ready(
        dynamic_low_rank_forward(x_odd, U, S, V, bias, activation=activation))
    ref_odd = reference_forward(x_odd, U, S, V, bias, activation=activation)
    assert out_odd.shape == (13, output_size)
    assert jnp.allclose(out_odd, ref_odd, atol=1e-5, rtol=1e-5), "ragged-batch mismatch"

    print("KERNEL_OK")
</pallas_src>

<mosaic_0001>
module attributes {stable_mosaic.version = 11 : i64} {
  func.func @_dlr_kernel(%arg0: i32, %arg1: memref<16x32xf32, #tpu.memory_space<vmem>>, %arg2: memref<32x8xf32, #tpu.memory_space<vmem>>, %arg3: memref<8x24xf32, #tpu.memory_space<vmem>>, %arg4: memref<1x24xf32, #tpu.memory_space<vmem>>, %arg5: memref<16x24xf32, #tpu.memory_space<vmem>>) attributes {dimension_semantics = [#tpu.dimension_semantics<parallel>], iteration_bounds = array<i64: 1>, scalar_prefetch = 0 : i64, scratch_operands = 0 : i64, tpu.core_type = #tpu.core_type<tc>, window_params = [{transform_indices = @transform_0, window_bounds = array<i64: 16, 32>}, {pipeline_mode = #tpu.pipeline_mode<synchronous>, transform_indices = @transform_1, window_bounds = array<i64: 32, 8>}, {pipeline_mode = #tpu.pipeline_mode<synchronous>, transform_indices = @transform_2, window_bounds = array<i64: 8, 24>}, {pipeline_mode = #tpu.pipeline_mode<synchronous>, transform_indices = @transform_3, window_bounds = array<i64: 1, 24>}, {transform_indices = @transform_4, window_bounds = array<i64: 16, 24>}]} {
    %c0 = arith.constant 0 : index
    %c0_0 = arith.constant 0 : index
    %0 = vector.load %arg1[%c0, %c0_0] : memref<16x32xf32, #tpu.memory_space<vmem>>, vector<16x32xf32>
    %c0_1 = arith.constant 0 : index
    %c0_2 = arith.constant 0 : index
    %1 = vector.load %arg2[%c0_1, %c0_2] : memref<32x8xf32, #tpu.memory_space<vmem>>, vector<32x8xf32>
    %cst = arith.constant dense<0.000000e+00> : vector<16x8xf32>
    %2 = tpu.matmul %0, %1, %cst {dimension_numbers = #tpu.dot_dimension_numbers<[1], [0], [0], [1], [0, 0, 1, 1], [], []>} : vector<16x32xf32>, vector<32x8xf32>, vector<16x8xf32> -> vector<16x8xf32>
    %c0_3 = arith.constant 0 : index
    %c0_4 = arith.constant 0 : index
    %3 = vector.load %arg3[%c0_3, %c0_4] : memref<8x24xf32, #tpu.memory_space<vmem>>, vector<8x24xf32>
    %cst_5 = arith.constant dense<0.000000e+00> : vector<16x24xf32>
    %4 = tpu.matmul %2, %3, %cst_5 {dimension_numbers = #tpu.dot_dimension_numbers<[1], [0], [0], [1], [0, 0, 1, 1], [], []>} : vector<16x8xf32>, vector<8x24xf32>, vector<16x24xf32> -> vector<16x24xf32>
    %c0_6 = arith.constant 0 : index
    %c0_7 = arith.constant 0 : index
    %5 = vector.load %arg4[%c0_6, %c0_7] : memref<1x24xf32, #tpu.memory_space<vmem>>, vector<1x24xf32>
    %6 = vector.broadcast %5 : vector<1x24xf32> to vector<16x24xf32>
    %7 = arith.addf %4, %6 : vector<16x24xf32>
    %cst_8 = arith.constant 0.000000e+00 : f32
    %8 = vector.broadcast %cst_8 : f32 to vector<16x24xf32>
    %9 = arith.maximumf %7, %8 : vector<16x24xf32>
    %c0_9 = arith.constant 0 : index
    %c0_10 = arith.constant 0 : index
    %10 = vector.load %arg5[%c0_9, %c0_10] : memref<16x24xf32, #tpu.memory_space<vmem>>, vector<16x24xf32>
    tpu.vector_store %arg5[%c0_9, %c0_10], %9 {strides = array<i32>} : memref<16x24xf32, #tpu.memory_space<vmem>>, vector<16x24xf32>,
    return
  }
  func.func @transform_0(%arg0: i32) -> (i32, i32) {
    %c0_i32 = arith.constant 0 : i32
    %c0_i32_0 = arith.constant 0 : i32
    return %arg0, %c0_i32 : i32, i32
  }
  func.func @transform_1(%arg0: i32) -> (i32, i32) {
    %c0_i32 = arith.constant 0 : i32
    %c0_i32_0 = arith.constant 0 : i32
    %c0_i32_1 = arith.constant 0 : i32
    return %c0_i32, %c0_i32_0 : i32, i32
  }
  func.func @transform_2(%arg0: i32) -> (i32, i32) {
    %c0_i32 = arith.constant 0 : i32
    %c0_i32_0 = arith.constant 0 : i32
    %c0_i32_1 = arith.constant 0 : i32
    return %c0_i32, %c0_i32_0 : i32, i32
  }
  func.func @transform_3(%arg0: i32) -> (i32, i32) {
    %c0_i32 = arith.constant 0 : i32
    %c0_i32_0 = arith.constant 0 : i32
    %c0_i32_1 = arith.constant 0 : i32
    return %c0_i32, %c0_i32_0 : i32, i32
  }
  func.func @transform_4(%arg0: i32) -> (i32, i32) {
    %c0_i32 = arith.constant 0 : i32
    %c0_i32_0 = arith.constant 0 : i32
    return %arg0, %c0_i32 : i32, i32
  }
}

</mosaic_0001>

<bundles_post_ra>
// kernel: tpu_custom_call.1
= control target key start
LH: loop header
LB: loop body
LE: loop exit
PB: predicated region body
PF: predicated region fallthrough
CT: control target
= control target key end

     0   :  { %vm24_vm0 = vcmask 261120   ;;  %s346_s0 = inlined_call_operand.vmem [shape: f32[16,32], index: 0, kind: input, shape index: {}]   ;;  %s347_s1 = inlined_call_operand.vmem [shape: f32[32,8], index: 1, kind: input, shape index: {}]   ;;  %s348_s2 = inlined_call_operand.vmem [shape: f32[8,24], index: 2, kind: input, shape index: {}]   ;;  %s349_s3 = inlined_call_operand.vmem [shape: f32[1,24], index: 3, kind: input, shape index: {}]   ;;  %s350_s4 = inlined_call_operand.hbm [shape: f32[16,24], index: 4, kind: output, shape index: {}]  }
   0x1   :  { %v20_v0 = vld [vmem:[%s347_s1] sm:$0xff]  ;;  %v21_v1 = vld [vmem:[%s347_s1 + $0x8] sm:$0xff]  ;;  %v22_v2 = vld [vmem:[%s347_s1 + $0x10] sm:$0xff] }
   0x2   :  { %v247_v3 = vpack.c.bf16 %v21_v1, %v20_v0  ;;  %v23_v4 = vld [vmem:[%s347_s1 + $0x18] sm:$0xff]  ;;  %v18_v5 = vld [vmem:[%s346_s0] sm:$0xff] }
   0x3   :  { %v251_v6 = vpack.c.bf16 %v23_v4, %v22_v2  ;;  %239 = vmatprep.mubr.msk.f32.mxu0 %vm24_vm0, %v18_v5 }
   0x4   :  { %9 = vsyncpa [#allocation3], 0  ;;  %248 = vmatprep.subr.bf16.mxu0 %v247_v3  ;;  %v19_v7 = vld [vmem:[%s346_s0 + $0x8] sm:$0xff]  ;;  %v106_v8 = vld [vmem:[%s348_s2] sm:$0xff]  ;;  %vm114_vm1 = vcmask 64512   ;;  %s282_s30 = smov [#allocation2]  }
   0x5   :  { %250 = vmatpush3.bf16.msra.mxu0 %v247_v3  ;;  %242 = vmatprep.subr.mxu1 %v106_v8  ;;  %v219_v11 = vld [vmem:[%s349_s3] ss:$0 sm:$0xff]  ;;  %s206_s5 = sshll.u32 %s282_s30, 4  ;;  %vm198_vm2 = vcmask 195584   ;;  %s207_s5 = int_to_ptr.vmem [resolvable:$true] %s206_s5 }
   0x6   :  { %252 = vmatprep.subr.bf16.mxu0 %v251_v6  ;;  %243 = vmatpush3.msra.mxu1 %v106_v8  ;;  %s258_s0 = scalar_lea.vmem %s207_s5, 256  ;;  %p263_p1 = scmp.lt.s32.totalorder %s207_s5, %s207_s5 }
   0x7   :  { %p259_p0 = scmp.ne.s32.totalorder %s207_s5, %s258_s0  ;;  %p264_p2 = scmp.lt.s32.totalorder %s258_s0, %s258_s0 }
   0x9   :  { %254 = vmatpush3.bf16.msra.mxu0 %v251_v6  ;;  %p265_p3 = por %p264_p2, %p263_p1 }
   0xb   :  { %p266_p4 = pnand %p265_p3, %p259_p0 }
   0xc   :  { %240 = vmatmul.mubr.msk.f32.vlgmr.msra.gmra.mrb[0].mxu0 %vm24_vm0, %v19_v7 }
  0xdf   :  { %v241_v9 = vpop.f32.mrb[0].mxu0 }
  0xe0   :  { %v97_v10 = vpop.f32.mrb[1].mxu0 }
  0xe1   :  { %244 = vmatprep.mubr.msk.f32.mxu1 %vm114_vm1, %v97_v10 }
  0xe2   :  { %245 = vmatmul.mubr.msk.f32.vlgmr.msra.gmra.mrb[0].mxu1 %vm114_vm1, %v241_v9 }
 0x1b5   :  { %v246_v12 = vpop.f32.mrb[0].mxu1 }
 0x1b6   :  { %v193_v13 = vadd.f32 %v246_v12, %v219_v11  ;;  %v187_v14 = vpop.f32.mrb[1].mxu1 }
 0x1b7   :  { %v188_v15 = vadd.f32 %v219_v11, %v187_v14 }
 0x1b8   :  { %v197_v16 = vmax.f32 %v193_v13, 0.0 }
 0x1b9   :  { %v196_v17 = vmax.f32 %v188_v15, 0.0 }
 0x1ba   :  { %200 = vst.msk [vmem:[#allocation2 + $0x8] sm:$0xff] %vm198_vm2, %v197_v16 }
 0x1bb   :  { %199 = vst.msk [vmem:[#allocation2] sm:$0xff] %vm198_vm2, %v196_v17 }
 0x1bc   :  { %269 = shalt.err (!%p266_p4)
}
 0x1bd   :  { %s270_s6 = scalar_lea.hbm %s350_s4, 256 }
 0x1be   :  { %p271_p5 = scmp.ne.s32.totalorder %s350_s4, %s270_s6  ;;  %p274_p6 = scmp.lt.u32.totalorder %s270_s6, %s350_s4 }
 0x1c0   :  { %p276_p7 = pnand %p274_p6, %p271_p5 }
 0x1c2   :  { %279 = shalt.err (!%p276_p7)
}
 0x1c3   :  { %s283_s11 = smov 128   ;;  %s284_s12 = smov 8  }
 0x1c4   :  { %212 = dma.vmem_to_hbm [thread:$0]  %s207_s5, 256, %s350_s4, [#allocation3], %s283_s11, %s283_s11, %s284_s12  }
 0x1c5   :  { %280 = dma.done.wait [#allocation3], 256  }
 0x1c6   :  { %281 = vsyncadd [#allocation3], 4294967040 }
 0x1c7   :  { %216 = vsyncpa [#allocation3], 1 }

</bundles_post_ra>
